<compile_context>
chip_gen: v6e
topology: v6e:2x2x1
jax: 0.10.0
libtpu: 0.0.40
codegen_flags: <defaults>
</compile_context>

<pallas_src>
import jax
import jax.numpy as jnp
from jax.experimental import pallas as pl
from jax.experimental.pallas import tpu as pltpu


def _round_up(x, m):
    return (x + m - 1) // m * m


# ---------------------------------------------------------------------------
# Kernels
# ---------------------------------------------------------------------------
def _bnc_packed_kernel(x_ref, w_ref, b_ref, o_ref):
    # x_ref: (tb, c*p)  w_ref: (c*p, nc*p)  b_ref: (1, nc*p)  o_ref: (tb, nc*p)
    # Weights/bias have constant block indices -> VMEM-resident across steps.
    o_ref[...] = (
        jnp.dot(x_ref[...], w_ref[...], preferred_element_type=jnp.float32)
        + b_ref[...]
    )


def _bnc_perhead_kernel(x_ref, w_ref, b_ref, o_ref):
    # x_ref: (1, tb, c)  w_ref: (1, c, nc)  b_ref: (1, 1, nc)  o_ref: (1, tb, nc)
    o_ref[0] = (
        jnp.dot(x_ref[0], w_ref[0], preferred_element_type=jnp.float32)
        + b_ref[0]
    )


# ---------------------------------------------------------------------------
# Wrapper
# ---------------------------------------------------------------------------
def _fold_bn_into_weights(gamma, beta, running_mean, running_var, W, eps):
    """Fold eval-mode BN (per-head, per-channel affine) into the classifier.

    In real use, precompute this once outside the per-step jit (weights are
    constants); here it is tiny and trivially hoisted / constant-folded.
    """
    scale = gamma / jnp.sqrt(running_var + eps)            # (p, c)
    shift = beta - running_mean * scale                    # (p, c)
    w_t = jnp.transpose(W, (0, 2, 1))                      # (p, c, nc)
    w_fold = scale[:, :, None] * w_t                       # (p, c, nc)
    bias = jnp.einsum('pc,pcn->pn', shift, w_t)            # (p, nc)
    return w_fold, bias


def bnc_forward(x, gamma, beta, running_mean, running_var, W, eps=1e-5,
                block_b=512, force_per_head=False):
    """x: (b, c, p); gamma/beta/mean/var: (p, c); W: (p, num_classes, c).

    Returns (b, num_classes, p) float32, matching the PyTorch module.

    Compute dtype follows x.dtype: to get the bf16 bandwidth win on v6e/v7x,
    produce bf16 x upstream (no wrapper-side cast is done here on purpose).
    """
    b, c, p = x.shape
    nc = W.shape[1]
    compute_dtype = x.dtype
    itemsize = jnp.dtype(compute_dtype).itemsize

    # One-time weight prep (hoist / precompute in real deployments).
    w_fold, bias = _fold_bn_into_weights(gamma, beta, running_mean,
                                         running_var, W, eps)

    # Batch tiling: tb a multiple of the sublane tile, capped at block_b
    # (~0.5 MiB f32 per x buffer at tb=512 -> fits v5e/v7x scoped VMEM easily).
    sub = max(8, 32 // max(1, itemsize))        # 8 f32, 16 bf16, 32 int8
    tb = min(block_b, _round_up(b, sub))
    tb = _round_up(tb, sub)
    b_pad = _round_up(b, tb)
    nbt = b_pad // tb

    # Path selection: the block-diagonal packed weight is only worthwhile when
    # it is small (at production fastreid shapes it is (p-1)/p zeros and blows
    # up VMEM / weight DMA / MXU work by ~p x, breaking on v7x's 64 MiB first).
    packed_w_bytes = (c * p) * (nc * p) * itemsize
    use_packed = (not force_per_head) and packed_w_bytes <= (2 << 20)

    if use_packed:
        cp, ncp = c * p, nc * p
        # Block-diagonal packing matched to the row-major flattening of x:
        #   Wbig[k*p + i, n*p + j] = w_fold[i, k, n] * delta(i, j)
        # so no input or output transpose is ever materialized.
        eye_p = jnp.eye(p, dtype=w_fold.dtype)
        w_big = jnp.einsum('pcn,pq->cpnq', w_fold, eye_p).reshape(cp, ncp)
        w_big = w_big.astype(compute_dtype)
        bias_row = bias.T.reshape(1, ncp).astype(jnp.float32)

        x_flat = x.reshape(b, cp)               # free reshape, no cast
        if b_pad != b:
            x_flat = jnp.pad(x_flat, ((0, b_pad - b), (0, 0)))

        cost = pl.CostEstimate(
            flops=2 * b_pad * cp * ncp,
            transcendentals=0,
            bytes_accessed=(b_pad * cp * itemsize + cp * ncp * itemsize
                            + ncp * 4 + b_pad * ncp * 4),
        )

        # NOTE: output lane width is nc*p (64 at the test shape) -> masked
        # partial stores; padding to 128 doubles output HBM bytes, so only do
        # it if a bundle dump shows store-slot (not DMA) pressure.
        out_flat = pl.pallas_call(
            _bnc_packed_kernel,
            out_shape=jax.ShapeDtypeStruct((b_pad, ncp), jnp.float32),
            grid=(nbt,),
            in_specs=[
                pl.BlockSpec((tb, cp), lambda i: (i, 0)),
                pl.BlockSpec((cp, ncp), lambda i: (0, 0)),   # resident weights
                pl.BlockSpec((1, ncp), lambda i: (0, 0)),    # resident bias
            ],
            out_specs=pl.BlockSpec((tb, ncp), lambda i: (i, 0)),
            compiler_params=pltpu.CompilerParams(
                dimension_semantics=("parallel",)),
            cost_estimate=cost,
        )(x_flat, w_big, bias_row)                           # (b_pad, nc*p)

        return out_flat[:b].reshape(b, nc, p)                # no transpose

    # ----- Per-head grid path (production-sized c / num_classes) -----
    # One layout pass so each head's tile is lane-dense along c; x is then read
    # from HBM exactly once by the pipelined grid.
    x_t = jnp.transpose(x, (2, 0, 1))                        # (p, b, c)
    if b_pad != b:
        x_t = jnp.pad(x_t, ((0, 0), (0, b_pad - b), (0, 0)))
    w_h = w_fold.astype(compute_dtype)                       # (p, c, nc)
    bias_h = bias.reshape(p, 1, nc).astype(jnp.float32)      # (p, 1, nc)

    cost = pl.CostEstimate(
        flops=2 * b_pad * c * nc * p,
        transcendentals=0,
        bytes_accessed=(p * b_pad * c * itemsize + p * c * nc * itemsize
                        + p * nc * 4 + p * b_pad * nc * 4),
    )

    out_t = pl.pallas_call(
        _bnc_perhead_kernel,
        out_shape=jax.ShapeDtypeStruct((p, b_pad, nc), jnp.float32),
        grid=(nbt, p),
        in_specs=[
            pl.BlockSpec((1, tb, c), lambda i, h: (h, i, 0)),
            pl.BlockSpec((1, c, nc), lambda i, h: (h, 0, 0)),
            pl.BlockSpec((1, 1, nc), lambda i, h: (h, 0, 0)),
        ],
        out_specs=pl.BlockSpec((1, tb, nc), lambda i, h: (h, i, 0)),
        compiler_params=pltpu.CompilerParams(
            dimension_semantics=("parallel", "arbitrary")),
        cost_estimate=cost,
    )(x_t, w_h, bias_h)                                      # (p, b_pad, nc)

    return jnp.transpose(out_t[:, :b, :], (1, 2, 0))         # (b, nc, p)


def bnc_reference(x, gamma, beta, running_mean, running_var, W, eps=1e-5):
    """Plain-JAX reference mirroring the PyTorch per-head loop."""
    b, c, p = x.shape
    outs = []
    for i in range(p):
        xi = x[:, :, i]                                      # (b, c)
        yi = (xi - running_mean[i]) / jnp.sqrt(running_var[i] + eps)
        yi = yi * gamma[i] + beta[i]
        outs.append(yi @ W[i].T)                             # (b, nc)
    return jnp.stack(outs, axis=-1)                          # (b, nc, p)


if __name__ == "__main__":
    # Small shapes consistent with the module: inplane=32, num_classes=16, num_heads=4.
    b, c, nc, p = 2, 32, 16, 4

    key = jax.random.PRNGKey(0)
    k_x, k_mean, k_var, k_w, k_x2 = jax.random.split(key, 5)

    x = jax.random.normal(k_x, (b, c, p), dtype=jnp.float32)

    # Deterministic parameter init mimicking the module's __init__:
    #   BN: weights_init_kaiming -> gamma = 1; bias_freeze=True -> beta = 0.
    gamma = jnp.ones((p, c), dtype=jnp.float32)
    beta = jnp.zeros((p, c), dtype=jnp.float32)
    # Non-trivial running stats so the BN affine actually does something.
    running_mean = 0.1 * jax.random.normal(k_mean, (p, c), dtype=jnp.float32)
    running_var = 0.5 + jnp.abs(jax.random.normal(k_var, (p, c), dtype=jnp.float32))
    #   Linear: weights_init_classifier -> normal(std=0.001), no bias.
    W = 0.001 * jax.random.normal(k_w, (p, nc, c), dtype=jnp.float32)

    # Packed (block-diagonal) path at the tiny shape.
    out = bnc_forward(x, gamma, beta, running_mean, running_var, W)
    out = jax.block_until_ready(out)
    ref = bnc_reference(x, gamma, beta, running_mean, running_var, W)
    assert out.shape == (b, nc, p), out.shape
    # Slightly looser rtol: folding BN into W reassociates the FP reduction.
    assert jnp.allclose(out, ref, atol=1e-5, rtol=1e-4), "packed path mismatch"

    # Exercise the batch grid (multiple tiles + ragged tail padding) and the
    # per-head fallback path on a slightly larger batch.
    b2 = 20
    x2 = jax.random.normal(k_x2, (b2, c, p), dtype=jnp.float32)
    ref2 = bnc_reference(x2, gamma, beta, running_mean, running_var, W)

    out2 = bnc_forward(x2, gamma, beta, running_mean, running_var, W, block_b=8)
    out2 = jax.block_until_ready(out2)
    assert out2.shape == (b2, nc, p), out2.shape
    assert jnp.allclose(out2, ref2, atol=1e-5, rtol=1e-4), "tiled packed mismatch"

    out3 = bnc_forward(x2, gamma, beta, running_mean, running_var, W,
                       block_b=8, force_per_head=True)
    out3 = jax.block_until_ready(out3)
    assert out3.shape == (b2, nc, p), out3.shape
    assert jnp.allclose(out3, ref2, atol=1e-5, rtol=1e-4), "per-head path mismatch"

    print("KERNEL_OK")
</pallas_src>

<mosaic_0001>
module attributes {stable_mosaic.version = 11 : i64} {
  func.func @_bnc_packed_kernel(%arg0: i32, %arg1: memref<8x128xf32, #tpu.memory_space<vmem>>, %arg2: memref<128x64xf32, #tpu.memory_space<vmem>>, %arg3: memref<1x64xf32, #tpu.memory_space<vmem>>, %arg4: memref<8x64xf32, #tpu.memory_space<vmem>>) attributes {dimension_semantics = [#tpu.dimension_semantics<parallel>], iteration_bounds = array<i64: 1>, scalar_prefetch = 0 : i64, scratch_operands = 0 : i64, tpu.core_type = #tpu.core_type<tc>, window_params = [{transform_indices = @transform_0, window_bounds = array<i64: 8, 128>}, {pipeline_mode = #tpu.pipeline_mode<synchronous>, transform_indices = @transform_1, window_bounds = array<i64: 128, 64>}, {pipeline_mode = #tpu.pipeline_mode<synchronous>, transform_indices = @transform_2, window_bounds = array<i64: 1, 64>}, {transform_indices = @transform_3, window_bounds = array<i64: 8, 64>}]} {
    %c0 = arith.constant 0 : index
    %c0_0 = arith.constant 0 : index
    %0 = vector.load %arg1[%c0, %c0_0] : memref<8x128xf32, #tpu.memory_space<vmem>>, vector<8x128xf32>
    %c0_1 = arith.constant 0 : index
    %c0_2 = arith.constant 0 : index
    %1 = vector.load %arg2[%c0_1, %c0_2] : memref<128x64xf32, #tpu.memory_space<vmem>>, vector<128x64xf32>
    %cst = arith.constant dense<0.000000e+00> : vector<8x64xf32>
    %2 = tpu.matmul %0, %1, %cst {dimension_numbers = #tpu.dot_dimension_numbers<[1], [0], [0], [1], [0, 0, 1, 1], [], []>} : vector<8x128xf32>, vector<128x64xf32>, vector<8x64xf32> -> vector<8x64xf32>
    %c0_3 = arith.constant 0 : index
    %c0_4 = arith.constant 0 : index
    %3 = vector.load %arg3[%c0_3, %c0_4] : memref<1x64xf32, #tpu.memory_space<vmem>>, vector<1x64xf32>
    %4 = vector.broadcast %3 : vector<1x64xf32> to vector<8x64xf32>
    %5 = arith.addf %2, %4 : vector<8x64xf32>
    %c0_5 = arith.constant 0 : index
    %c0_6 = arith.constant 0 : index
    %6 = vector.load %arg4[%c0_5, %c0_6] : memref<8x64xf32, #tpu.memory_space<vmem>>, vector<8x64xf32>
    tpu.vector_store %arg4[%c0_5, %c0_6], %5 {strides = array<i32>} : memref<8x64xf32, #tpu.memory_space<vmem>>, vector<8x64xf32>,
    return
  }
  func.func @transform_0(%arg0: i32) -> (i32, i32) {
    %c0_i32 = arith.constant 0 : i32
    %c0_i32_0 = arith.constant 0 : i32
    return %arg0, %c0_i32 : i32, i32
  }
  func.func @transform_1(%arg0: i32) -> (i32, i32) {
    %c0_i32 = arith.constant 0 : i32
    %c0_i32_0 = arith.constant 0 : i32
    %c0_i32_1 = arith.constant 0 : i32
    return %c0_i32, %c0_i32_0 : i32, i32
  }
  func.func @transform_2(%arg0: i32) -> (i32, i32) {
    %c0_i32 = arith.constant 0 : i32
    %c0_i32_0 = arith.constant 0 : i32
    %c0_i32_1 = arith.constant 0 : i32
    return %c0_i32, %c0_i32_0 : i32, i32
  }
  func.func @transform_3(%arg0: i32) -> (i32, i32) {
    %c0_i32 = arith.constant 0 : i32
    %c0_i32_0 = arith.constant 0 : i32
    return %arg0, %c0_i32 : i32, i32
  }
}

</mosaic_0001>

<bundles_post_ra>
// kernel: tpu_custom_call.1
= control target key start
LH: loop header
LB: loop body
LE: loop exit
PB: predicated region body
PF: predicated region fallthrough
CT: control target
= control target key end

     0   :  { %v203_v1 = vmov 0.0   ;;  %vm204_vm0 = vmmov 0   ;;  %s283_s0 = inlined_call_operand.vmem [shape: f32[8,128], index: 0, kind: input, shape index: {}]   ;;  %s284_s1 = inlined_call_operand.vmem [shape: f32[128,64], index: 1, kind: input, shape index: {}]   ;;  %s285_s2 = inlined_call_operand.vmem [shape: f32[1,64], index: 2, kind: input, shape index: {}]   ;;  %s286_s3 = inlined_call_operand.hbm [shape: f32[8,64], index: 3, kind: output, shape index: {}]  }
   0x1   :  { %v31_v0 = vld [vmem:[%s284_s1 + $0x78] sm:$0xff]  ;;  %143 = vmatprep.subr.mxu0 %v203_v1  ;;  %v30_v2 = vld [vmem:[%s284_s1 + $0x70] sm:$0xff]  ;;  %175 = vmatprep.mubr.msk.f32.mxu0 %vm204_vm0, %v203_v1  ;;  %v29_v3 = vld [vmem:[%s284_s1 + $0x68] sm:$0xff] }
   0x2   :  { %144 = vmatpush3.msra.mxu0 %v31_v0  ;;  %v28_v4 = vld [vmem:[%s284_s1 + $0x60] sm:$0xff] }
   0x3   :  { %145 = vmatprep.subr.mxu0 %v203_v1 }
   0x4   :  { %146 = vmatpush3.msra.mxu0 %v30_v2 }
   0x5   :  { %147 = vmatprep.subr.mxu0 %v203_v1 }
   0x6   :  { %148 = vmatpush3.msra.mxu0 %v29_v3 }
   0x7   :  { %8 = vsyncpa [#allocation3], 0  ;;  %149 = vmatprep.subr.mxu0 %v203_v1  ;;  %v27_v5 = vld [vmem:[%s284_s1 + $0x58] sm:$0xff]  ;;  %v26_v6 = vld [vmem:[%s284_s1 + $0x50] sm:$0xff]  ;;  %s205_s21 = smov [#allocation2]   ;;  %vm109_vm1 = vcmask 523264  }
   0x8   :  { %150 = vmatpush3.msra.mxu0 %v28_v4  ;;  %v25_v7 = vld [vmem:[%s284_s1 + $0x48] sm:$0xff]  ;;  %v24_v8 = vld [vmem:[%s284_s1 + $0x40] sm:$0xff]  ;;  %v23_v9 = vld [vmem:[%s284_s1 + $0x38] sm:$0xff]  ;;  %s117_s22 = sshll.u32 %s205_s21, 4  ;;  %s118_s22 = int_to_ptr.vmem [resolvable:$true] %s117_s22 }
   0x9   :  { %151 = vmatprep.subr.mxu0 %v203_v1  ;;  %v22_v10 = vld [vmem:[%s284_s1 + $0x30] sm:$0xff]  ;;  %v21_v11 = vld [vmem:[%s284_s1 + $0x28] sm:$0xff]  ;;  %v20_v12 = vld [vmem:[%s284_s1 + $0x20] sm:$0xff]  ;;  %p186_p1 = scmp.lt.s32.totalorder %s118_s22, %s118_s22 }
   0xa   :  { %152 = vmatpush3.msra.mxu0 %v27_v5  ;;  %v19_v13 = vld [vmem:[%s284_s1 + $0x18] sm:$0xff]  ;;  %v18_v14 = vld [vmem:[%s284_s1 + $0x10] sm:$0xff]  ;;  %v17_v15 = vld [vmem:[%s284_s1 + $0x8] sm:$0xff] }
   0xb   :  { %153 = vmatprep.subr.mxu0 %v203_v1  ;;  %v16_v16 = vld [vmem:[%s284_s1] sm:$0xff]  ;;  %s181_s1 = scalar_lea.vmem %s118_s22, 128 }
   0xc   :  { %154 = vmatpush3.msra.mxu0 %v26_v6  ;;  %v15_v17 = vld [vmem:[%s283_s0] sm:$0xff]  ;;  %p182_p0 = scmp.ne.s32.totalorder %s118_s22, %s181_s1  ;;  %p187_p2 = scmp.lt.s32.totalorder %s181_s1, %s181_s1 }
   0xd   :  { %155 = vmatprep.subr.mxu0 %v203_v1  ;;  %v125_v18 = vld [vmem:[%s285_s2] ss:$0 sm:$0xff] }
   0xe   :  { %156 = vmatpush3.msra.mxu0 %v25_v7  ;;  %p188_p3 = por %p187_p2, %p186_p1 }
   0xf   :  { %157 = vmatprep.subr.mxu0 %v203_v1 }
  0x10   :  { %158 = vmatpush3.msra.mxu0 %v24_v8  ;;  %p189_p4 = pnand %p188_p3, %p182_p0 }
  0x11   :  { %159 = vmatprep.subr.mxu0 %v203_v1 }
  0x12   :  { %160 = vmatpush3.msra.mxu0 %v23_v9 }
  0x13   :  { %161 = vmatprep.subr.mxu0 %v203_v1 }
  0x14   :  { %162 = vmatpush3.msra.mxu0 %v22_v10 }
  0x15   :  { %163 = vmatprep.subr.mxu0 %v203_v1 }
  0x16   :  { %164 = vmatpush3.msra.mxu0 %v21_v11 }
  0x17   :  { %165 = vmatprep.subr.mxu0 %v203_v1 }
  0x18   :  { %166 = vmatpush3.msra.mxu0 %v20_v12 }
  0x19   :  { %167 = vmatprep.subr.mxu0 %v203_v1 }
  0x1a   :  { %168 = vmatpush3.msra.mxu0 %v19_v13 }
  0x1b   :  { %169 = vmatprep.subr.mxu0 %v203_v1 }
  0x1c   :  { %170 = vmatpush3.msra.mxu0 %v18_v14 }
  0x1d   :  { %171 = vmatprep.subr.mxu0 %v203_v1 }
  0x1e   :  { %172 = vmatpush3.msra.mxu0 %v17_v15 }
  0x1f   :  { %173 = vmatprep.subr.mxu0 %v203_v1 }
  0x20   :  { %174 = vmatpush3.msra.mxu0 %v16_v16 }
  0x21   :  { %176 = vmatmul.mubr.f32.vlgmr.msra.gmra.mxu0 %v15_v17 }
  0xe1   :  { %v105_v19 = vpop.f32.mrf.mxu0 }
  0xe2   :  { %v106_v20 = vadd.f32 %v125_v18, %v105_v19 }
  0xe3   :  { %v177_v21 = vpop.f32.mrf.mxu0 }
  0xe4   :  { %110 = vst.msk [vmem:[#allocation2] sm:$0xff] %vm109_vm1, %v106_v20 }
  0xe5   :  { %192 = shalt.err (!%p189_p4)
}
  0xe6   :  { %120 = dma.vmem_to_hbm [thread:$0]  %s118_s22, 128, %s286_s3, [#allocation3]  }
  0xe7   :  { %201 = dma.done.wait [#allocation3], 128  }
  0xe8   :  { %202 = vsyncadd [#allocation3], 4294967168 }
  0xe9   :  { %124 = vsyncpa [#allocation3], 1 }

</bundles_post_ra>
